<compile_context>
chip_gen: v7x
topology: tpu7x:2x2x1
jax: 0.10.0
libtpu: 0.0.40
codegen_flags: <defaults>
</compile_context>

<pallas_src>
import functools

import jax
import jax.numpy as jnp
from jax.experimental import pallas as pl
from jax.experimental.pallas import tpu as pltpu


def _round_up(x, m):
    return int(pl.cdiv(x, m) * m)


def _local_gru_kernel(x_ref, wih_ref, whh_ref, bih_ref, bhh_ref, o_ref,
                      *, ksize, halo_load):
    """One grid step: GRU over causal windows for `tile_l` sequence positions.

    x_ref  : (1, L_total, D)  causally zero-padded sequence of this batch elem
    wih_ref: (D, 3H)          input->gates weights (transposed), order [r|z|n]
    whh_ref: (H, 3H)          hidden->gates weights (transposed)
    bih_ref: (1, 3H)          input bias
    bhh_ref: (1, 3H)          hidden bias
    o_ref  : (1, tile_l, H)   last-step hidden state for this tile
    """
    _, tile_l, H = o_ref.shape
    j = pl.program_id(1)
    start = pl.multiple_of(j * tile_l, 8)

    # Haloed input slab for this tile, projected through W_ih ONCE
    # (input projection hoisted out of the recurrence).
    xh = x_ref[0, pl.ds(start, halo_load), :]                  # (halo_load, D)
    gx_all = jnp.dot(xh, wih_ref[...], preferred_element_type=jnp.float32)
    gx_all = gx_all + bih_ref[...].astype(jnp.float32)         # (halo_load, 3H)

    whh = whh_ref[...]
    # Hoisted broadcast (JAX does not CSE broadcast_in_dim inside the loop).
    bhh = jnp.broadcast_to(bhh_ref[...], (tile_l, 3 * H)).astype(jnp.float32)

    # ksize is small and static -> unrolled loop; h lives in vregs.
    h = None
    for k in range(ksize):
        gx = gx_all[k:k + tile_l, :]                           # (tile_l, 3H)
        if h is None:                                          # h == 0 exactly
            gh = bhh
        else:
            gh = jnp.dot(h, whh, preferred_element_type=jnp.float32) + bhh
        r = jax.nn.sigmoid(gx[:, 0 * H:1 * H] + gh[:, 0 * H:1 * H])
        z = jax.nn.sigmoid(gx[:, 1 * H:2 * H] + gh[:, 1 * H:2 * H])
        n = jnp.tanh(gx[:, 2 * H:3 * H] + r * gh[:, 2 * H:3 * H])
        h = (1.0 - z) * n if h is None else (1.0 - z) * n + z * h

    o_ref[0, :, :] = h.astype(o_ref.dtype)


@functools.partial(jax.jit, static_argnames=("ksize", "tile_l"))
def local_rnn_forward(x, w_ih_t, w_hh_t, b_ih, b_hh, *, ksize, tile_l=256):
    B, L, D = x.shape
    H = w_hh_t.shape[0]

    # Sequence-row tile (sublane aligned), clamped to the (padded) sequence.
    tile_l = _round_up(max(8, min(tile_l, _round_up(L, 8))), 8)
    L_pad = _round_up(L, tile_l)
    num_l_tiles = L_pad // tile_l

    halo = tile_l + ksize - 1
    halo_load = _round_up(halo, 8)            # aligned in-kernel load size
    L_total = L_pad + (halo_load - tile_l)    # every halo window stays in bounds

    left = ksize - 1                          # causal zero padding
    right = L_total - left - L                # tail padding (small)
    x_pad = jnp.pad(x, ((0, 0), (left, right), (0, 0)))

    kernel = functools.partial(_local_gru_kernel, ksize=ksize,
                               halo_load=halo_load)

    out = pl.pallas_call(
        kernel,
        out_shape=jax.ShapeDtypeStruct((B, L_pad, H), x.dtype),
        grid_spec=pltpu.PrefetchScalarGridSpec(
            num_scalar_prefetch=0,
            grid=(B, num_l_tiles),
            in_specs=[
                # Whole padded sequence of batch b: block index is constant
                # across the inner grid axis -> DMA'd from HBM once per batch.
                pl.BlockSpec((1, L_total, D), lambda b, j: (b, 0, 0)),
                pl.BlockSpec((D, 3 * H), lambda b, j: (0, 0)),
                pl.BlockSpec((H, 3 * H), lambda b, j: (0, 0)),
                pl.BlockSpec((1, 3 * H), lambda b, j: (0, 0)),
                pl.BlockSpec((1, 3 * H), lambda b, j: (0, 0)),
            ],
            out_specs=pl.BlockSpec((1, tile_l, H), lambda b, j: (b, j, 0)),
        ),
        compiler_params=pltpu.CompilerParams(
            dimension_semantics=("parallel", "parallel"),
            vmem_limit_bytes=64 * 1024 * 1024),
    )(x_pad, w_ih_t, w_hh_t, b_ih, b_hh)

    return out[:, :L, :]


# ----------------------------------------------------------------------------
# Pure-JAX reference (same math as the PyTorch module) for correctness checks.
# ----------------------------------------------------------------------------
def _get_K_ref(x, ksize):
    B, L, D = x.shape
    x_pad = jnp.concatenate(
        [jnp.zeros((B, ksize - 1, D), dtype=x.dtype), x], axis=1)
    idx = jnp.arange(L)[:, None] + jnp.arange(ksize)[None, :]   # (L, ksize)
    return x_pad[:, idx, :]                                     # (B, L, ksize, D)


def local_rnn_reference(x, w_ih_t, w_hh_t, b_ih, b_hh, ksize):
    B, L, D = x.shape
    H = w_hh_t.shape[0]
    K = _get_K_ref(x, ksize).reshape(B * L, ksize, D)
    h = jnp.zeros((B * L, H), jnp.float32)
    for k in range(ksize):
        gx = K[:, k, :].astype(jnp.float32) @ w_ih_t + b_ih
        gh = h @ w_hh_t + b_hh
        r = jax.nn.sigmoid(gx[:, :H] + gh[:, :H])
        z = jax.nn.sigmoid(gx[:, H:2 * H] + gh[:, H:2 * H])
        n = jnp.tanh(gx[:, 2 * H:] + r * gh[:, 2 * H:])
        h = (1.0 - z) * n + z * h
    return h.reshape(B, L, H).astype(x.dtype)


if __name__ == "__main__":
    def _check(B, L, D, H, ksize, tile_l):
        key = jax.random.PRNGKey(0)
        kx, k1, k2, k3, k4 = jax.random.split(key, 5)
        bound = float(H) ** -0.5   # PyTorch GRU default init range
        x = jax.random.normal(kx, (B, L, D), dtype=jnp.float32)
        # Weights stored pre-transposed: (D, 3H) / (H, 3H), gate order [r|z|n].
        w_ih_t = jax.random.uniform(k1, (D, 3 * H), jnp.float32, -bound, bound)
        w_hh_t = jax.random.uniform(k2, (H, 3 * H), jnp.float32, -bound, bound)
        b_ih = jax.random.uniform(k3, (1, 3 * H), jnp.float32, -bound, bound)
        b_hh = jax.random.uniform(k4, (1, 3 * H), jnp.float32, -bound, bound)

        out = local_rnn_forward(x, w_ih_t, w_hh_t, b_ih, b_hh,
                                ksize=ksize, tile_l=tile_l)
        out = jax.block_until_ready(out)
        ref = local_rnn_reference(x, w_ih_t, w_hh_t, b_ih, b_hh, ksize)
        assert out.shape == (B, L, H), out.shape
        assert jnp.allclose(out, ref, atol=1e-4, rtol=1e-4), "mismatch vs ref"

    # Small shapes consistent with the module's forward (single sequence tile).
    _check(B=2, L=8, D=32, H=32, ksize=4, tile_l=256)
    # Multi-tile path: non-multiple L, dynamic halo start, tail padding.
    _check(B=2, L=40, D=32, H=32, ksize=5, tile_l=16)

    print("KERNEL_OK")
</pallas_src>

<mosaic_0001>
module attributes {stable_mosaic.version = 11 : i64} {
  func.func @_local_gru_kernel(%arg0: i32, %arg1: i32, %arg2: memref<1x16x32xf32, #tpu.memory_space<vmem>>, %arg3: memref<32x96xf32, #tpu.memory_space<vmem>>, %arg4: memref<32x96xf32, #tpu.memory_space<vmem>>, %arg5: memref<1x96xf32, #tpu.memory_space<vmem>>, %arg6: memref<1x96xf32, #tpu.memory_space<vmem>>, %arg7: memref<1x8x32xf32, #tpu.memory_space<vmem>>) attributes {dimension_semantics = [#tpu.dimension_semantics<parallel>, #tpu.dimension_semantics<parallel>], iteration_bounds = array<i64: 2, 1>, scalar_prefetch = 0 : i64, scratch_operands = 0 : i64, tpu.core_type = #tpu.core_type<tc>, window_params = [{transform_indices = @transform_0, window_bounds = array<i64: 1, 16, 32>}, {pipeline_mode = #tpu.pipeline_mode<synchronous>, transform_indices = @transform_1, window_bounds = array<i64: 32, 96>}, {pipeline_mode = #tpu.pipeline_mode<synchronous>, transform_indices = @transform_2, window_bounds = array<i64: 32, 96>}, {pipeline_mode = #tpu.pipeline_mode<synchronous>, transform_indices = @transform_3, window_bounds = array<i64: 1, 96>}, {pipeline_mode = #tpu.pipeline_mode<synchronous>, transform_indices = @transform_4, window_bounds = array<i64: 1, 96>}, {transform_indices = @transform_5, window_bounds = array<i64: 1, 8, 32>}]} {
    %c8_i32 = arith.constant 8 : i32
    %0 = arith.muli %arg1, %c8_i32 : i32
    %1 = tpu.assume_multiple %0, 8 : i32
    %c0 = arith.constant 0 : index
    %2 = arith.index_cast %1 : i32 to index
    %c0_0 = arith.constant 0 : index
    %3 = vector.load %arg2[%c0, %2, %c0_0] : memref<1x16x32xf32, #tpu.memory_space<vmem>>, vector<1x16x32xf32>
    %4 = vector.shape_cast %3 : vector<1x16x32xf32> to vector<16x32xf32>
    %c0_1 = arith.constant 0 : index
    %c0_2 = arith.constant 0 : index
    %5 = vector.load %arg3[%c0_1, %c0_2] : memref<32x96xf32, #tpu.memory_space<vmem>>, vector<32x96xf32>
    %cst = arith.constant dense<0.000000e+00> : vector<16x96xf32>
    %6 = tpu.matmul %4, %5, %cst {dimension_numbers = #tpu.dot_dimension_numbers<[1], [0], [0], [1], [0, 0, 1, 1], [], []>} : vector<16x32xf32>, vector<32x96xf32>, vector<16x96xf32> -> vector<16x96xf32>
    %c0_3 = arith.constant 0 : index
    %c0_4 = arith.constant 0 : index
    %7 = vector.load %arg5[%c0_3, %c0_4] : memref<1x96xf32, #tpu.memory_space<vmem>>, vector<1x96xf32>
    %8 = vector.broadcast %7 : vector<1x96xf32> to vector<16x96xf32>
    %9 = arith.addf %6, %8 : vector<16x96xf32>
    %c0_5 = arith.constant 0 : index
    %c0_6 = arith.constant 0 : index
    %10 = vector.load %arg4[%c0_5, %c0_6] : memref<32x96xf32, #tpu.memory_space<vmem>>, vector<32x96xf32>
    %c0_7 = arith.constant 0 : index
    %c0_8 = arith.constant 0 : index
    %11 = vector.load %arg6[%c0_7, %c0_8] : memref<1x96xf32, #tpu.memory_space<vmem>>, vector<1x96xf32>
    %12 = vector.shape_cast %11 : vector<1x96xf32> to vector<1x96xf32>
    %13 = vector.broadcast %12 : vector<1x96xf32> to vector<8x96xf32>
    %14 = vector.extract_strided_slice %9 {offsets = [0, 0], sizes = [8, 96], strides = [1, 1]} : vector<16x96xf32> to vector<8x96xf32>
    %15 = vector.extract_strided_slice %14 {offsets = [0, 0], sizes = [8, 32], strides = [1, 1]} : vector<8x96xf32> to vector<8x32xf32>
    %16 = vector.extract_strided_slice %13 {offsets = [0, 0], sizes = [8, 32], strides = [1, 1]} : vector<8x96xf32> to vector<8x32xf32>
    %17 = arith.addf %15, %16 : vector<8x32xf32>
    %18 = arith.negf %17 : vector<8x32xf32>
    %19 = math.exp %18 : vector<8x32xf32>
    %cst_9 = arith.constant 1.000000e+00 : f32
    %20 = vector.broadcast %cst_9 : f32 to vector<8x32xf32>
    %21 = arith.addf %20, %19 : vector<8x32xf32>
    %22 = arith.divf %20, %21 : vector<8x32xf32>
    %23 = vector.extract_strided_slice %14 {offsets = [0, 32], sizes = [8, 32], strides = [1, 1]} : vector<8x96xf32> to vector<8x32xf32>
    %24 = vector.extract_strided_slice %13 {offsets = [0, 32], sizes = [8, 32], strides = [1, 1]} : vector<8x96xf32> to vector<8x32xf32>
    %25 = arith.addf %23, %24 : vector<8x32xf32>
    %26 = arith.negf %25 : vector<8x32xf32>
    %27 = math.exp %26 : vector<8x32xf32>
    %cst_10 = arith.constant 1.000000e+00 : f32
    %28 = vector.broadcast %cst_10 : f32 to vector<8x32xf32>
    %29 = arith.addf %28, %27 : vector<8x32xf32>
    %30 = arith.divf %28, %29 : vector<8x32xf32>
    %31 = vector.extract_strided_slice %14 {offsets = [0, 64], sizes = [8, 32], strides = [1, 1]} : vector<8x96xf32> to vector<8x32xf32>
    %32 = vector.extract_strided_slice %13 {offsets = [0, 64], sizes = [8, 32], strides = [1, 1]} : vector<8x96xf32> to vector<8x32xf32>
    %33 = arith.mulf %22, %32 : vector<8x32xf32>
    %34 = arith.addf %31, %33 : vector<8x32xf32>
    %35 = math.tanh %34 : vector<8x32xf32>
    %cst_11 = arith.constant 1.000000e+00 : f32
    %36 = vector.broadcast %cst_11 : f32 to vector<8x32xf32>
    %37 = arith.subf %36, %30 : vector<8x32xf32>
    %38 = arith.mulf %37, %35 : vector<8x32xf32>
    %39 = vector.extract_strided_slice %9 {offsets = [1, 0], sizes = [8, 96], strides = [1, 1]} : vector<16x96xf32> to vector<8x96xf32>
    %cst_12 = arith.constant dense<0.000000e+00> : vector<8x96xf32>
    %40 = tpu.matmul %38, %10, %cst_12 {dimension_numbers = #tpu.dot_dimension_numbers<[1], [0], [0], [1], [0, 0, 1, 1], [], []>} : vector<8x32xf32>, vector<32x96xf32>, vector<8x96xf32> -> vector<8x96xf32>
    %41 = arith.addf %40, %13 : vector<8x96xf32>
    %42 = vector.extract_strided_slice %39 {offsets = [0, 0], sizes = [8, 32], strides = [1, 1]} : vector<8x96xf32> to vector<8x32xf32>
    %43 = vector.extract_strided_slice %41 {offsets = [0, 0], sizes = [8, 32], strides = [1, 1]} : vector<8x96xf32> to vector<8x32xf32>
    %44 = arith.addf %42, %43 : vector<8x32xf32>
    %45 = arith.negf %44 : vector<8x32xf32>
    %46 = math.exp %45 : vector<8x32xf32>
    %cst_13 = arith.constant 1.000000e+00 : f32
    %47 = vector.broadcast %cst_13 : f32 to vector<8x32xf32>
    %48 = arith.addf %47, %46 : vector<8x32xf32>
    %49 = arith.divf %47, %48 : vector<8x32xf32>
    %50 = vector.extract_strided_slice %39 {offsets = [0, 32], sizes = [8, 32], strides = [1, 1]} : vector<8x96xf32> to vector<8x32xf32>
    %51 = vector.extract_strided_slice %41 {offsets = [0, 32], sizes = [8, 32], strides = [1, 1]} : vector<8x96xf32> to vector<8x32xf32>
    %52 = arith.addf %50, %51 : vector<8x32xf32>
    %53 = arith.negf %52 : vector<8x32xf32>
    %54 = math.exp %53 : vector<8x32xf32>
    %cst_14 = arith.constant 1.000000e+00 : f32
    %55 = vector.broadcast %cst_14 : f32 to vector<8x32xf32>
    %56 = arith.addf %55, %54 : vector<8x32xf32>
    %57 = arith.divf %55, %56 : vector<8x32xf32>
    %58 = vector.extract_strided_slice %39 {offsets = [0, 64], sizes = [8, 32], strides = [1, 1]} : vector<8x96xf32> to vector<8x32xf32>
    %59 = vector.extract_strided_slice %41 {offsets = [0, 64], sizes = [8, 32], strides = [1, 1]} : vector<8x96xf32> to vector<8x32xf32>
    %60 = arith.mulf %49, %59 : vector<8x32xf32>
    %61 = arith.addf %58, %60 : vector<8x32xf32>
    %62 = math.tanh %61 : vector<8x32xf32>
    %cst_15 = arith.constant 1.000000e+00 : f32
    %63 = vector.broadcast %cst_15 : f32 to vector<8x32xf32>
    %64 = arith.subf %63, %57 : vector<8x32xf32>
    %65 = arith.mulf %64, %62 : vector<8x32xf32>
    %66 = arith.mulf %57, %38 : vector<8x32xf32>
    %67 = arith.addf %65, %66 : vector<8x32xf32>
    %68 = vector.extract_strided_slice %9 {offsets = [2, 0], sizes = [8, 96], strides = [1, 1]} : vector<16x96xf32> to vector<8x96xf32>
    %cst_16 = arith.constant dense<0.000000e+00> : vector<8x96xf32>
    %69 = tpu.matmul %67, %10, %cst_16 {dimension_numbers = #tpu.dot_dimension_numbers<[1], [0], [0], [1], [0, 0, 1, 1], [], []>} : vector<8x32xf32>, vector<32x96xf32>, vector<8x96xf32> -> vector<8x96xf32>
    %70 = arith.addf %69, %13 : vector<8x96xf32>
    %71 = vector.extract_strided_slice %68 {offsets = [0, 0], sizes = [8, 32], strides = [1, 1]} : vector<8x96xf32> to vector<8x32xf32>
    %72 = vector.extract_strided_slice %70 {offsets = [0, 0], sizes = [8, 32], strides = [1, 1]} : vector<8x96xf32> to vector<8x32xf32>
    %73 = arith.addf %71, %72 : vector<8x32xf32>
    %74 = arith.negf %73 : vector<8x32xf32>
    %75 = math.exp %74 : vector<8x32xf32>
    %cst_17 = arith.constant 1.000000e+00 : f32
    %76 = vector.broadcast %cst_17 : f32 to vector<8x32xf32>
    %77 = arith.addf %76, %75 : vector<8x32xf32>
    %78 = arith.divf %76, %77 : vector<8x32xf32>
    %79 = vector.extract_strided_slice %68 {offsets = [0, 32], sizes = [8, 32], strides = [1, 1]} : vector<8x96xf32> to vector<8x32xf32>
    %80 = vector.extract_strided_slice %70 {offsets = [0, 32], sizes = [8, 32], strides = [1, 1]} : vector<8x96xf32> to vector<8x32xf32>
    %81 = arith.addf %79, %80 : vector<8x32xf32>
    %82 = arith.negf %81 : vector<8x32xf32>
    %83 = math.exp %82 : vector<8x32xf32>
    %cst_18 = arith.constant 1.000000e+00 : f32
    %84 = vector.broadcast %cst_18 : f32 to vector<8x32xf32>
    %85 = arith.addf %84, %83 : vector<8x32xf32>
    %86 = arith.divf %84, %85 : vector<8x32xf32>
    %87 = vector.extract_strided_slice %68 {offsets = [0, 64], sizes = [8, 32], strides = [1, 1]} : vector<8x96xf32> to vector<8x32xf32>
    %88 = vector.extract_strided_slice %70 {offsets = [0, 64], sizes = [8, 32], strides = [1, 1]} : vector<8x96xf32> to vector<8x32xf32>
    %89 = arith.mulf %78, %88 : vector<8x32xf32>
    %90 = arith.addf %87, %89 : vector<8x32xf32>
    %91 = math.tanh %90 : vector<8x32xf32>
    %cst_19 = arith.constant 1.000000e+00 : f32
    %92 = vector.broadcast %cst_19 : f32 to vector<8x32xf32>
    %93 = arith.subf %92, %86 : vector<8x32xf32>
    %94 = arith.mulf %93, %91 : vector<8x32xf32>
    %95 = arith.mulf %86, %67 : vector<8x32xf32>
    %96 = arith.addf %94, %95 : vector<8x32xf32>
    %97 = vector.extract_strided_slice %9 {offsets = [3, 0], sizes = [8, 96], strides = [1, 1]} : vector<16x96xf32> to vector<8x96xf32>
    %cst_20 = arith.constant dense<0.000000e+00> : vector<8x96xf32>
    %98 = tpu.matmul %96, %10, %cst_20 {dimension_numbers = #tpu.dot_dimension_numbers<[1], [0], [0], [1], [0, 0, 1, 1], [], []>} : vector<8x32xf32>, vector<32x96xf32>, vector<8x96xf32> -> vector<8x96xf32>
    %99 = arith.addf %98, %13 : vector<8x96xf32>
    %100 = vector.extract_strided_slice %97 {offsets = [0, 0], sizes = [8, 32], strides = [1, 1]} : vector<8x96xf32> to vector<8x32xf32>
    %101 = vector.extract_strided_slice %99 {offsets = [0, 0], sizes = [8, 32], strides = [1, 1]} : vector<8x96xf32> to vector<8x32xf32>
    %102 = arith.addf %100, %101 : vector<8x32xf32>
    %103 = arith.negf %102 : vector<8x32xf32>
    %104 = math.exp %103 : vector<8x32xf32>
    %cst_21 = arith.constant 1.000000e+00 : f32
    %105 = vector.broadcast %cst_21 : f32 to vector<8x32xf32>
    %106 = arith.addf %105, %104 : vector<8x32xf32>
    %107 = arith.divf %105, %106 : vector<8x32xf32>
    %108 = vector.extract_strided_slice %97 {offsets = [0, 32], sizes = [8, 32], strides = [1, 1]} : vector<8x96xf32> to vector<8x32xf32>
    %109 = vector.extract_strided_slice %99 {offsets = [0, 32], sizes = [8, 32], strides = [1, 1]} : vector<8x96xf32> to vector<8x32xf32>
    %110 = arith.addf %108, %109 : vector<8x32xf32>
    %111 = arith.negf %110 : vector<8x32xf32>
    %112 = math.exp %111 : vector<8x32xf32>
    %cst_22 = arith.constant 1.000000e+00 : f32
    %113 = vector.broadcast %cst_22 : f32 to vector<8x32xf32>
    %114 = arith.addf %113, %112 : vector<8x32xf32>
    %115 = arith.divf %113, %114 : vector<8x32xf32>
    %116 = vector.extract_strided_slice %97 {offsets = [0, 64], sizes = [8, 32], strides = [1, 1]} : vector<8x96xf32> to vector<8x32xf32>
    %117 = vector.extract_strided_slice %99 {offsets = [0, 64], sizes = [8, 32], strides = [1, 1]} : vector<8x96xf32> to vector<8x32xf32>
    %118 = arith.mulf %107, %117 : vector<8x32xf32>
    %119 = arith.addf %116, %118 : vector<8x32xf32>
    %120 = math.tanh %119 : vector<8x32xf32>
    %cst_23 = arith.constant 1.000000e+00 : f32
    %121 = vector.broadcast %cst_23 : f32 to vector<8x32xf32>
    %122 = arith.subf %121, %115 : vector<8x32xf32>
    %123 = arith.mulf %122, %120 : vector<8x32xf32>
    %124 = arith.mulf %115, %96 : vector<8x32xf32>
    %125 = arith.addf %123, %124 : vector<8x32xf32>
    %c0_24 = arith.constant 0 : index
    %c0_25 = arith.constant 0 : index
    %c0_26 = arith.constant 0 : index
    %126 = vector.load %arg7[%c0_24, %c0_25, %c0_26] : memref<1x8x32xf32, #tpu.memory_space<vmem>>, vector<1x8x32xf32>
    %127 = vector.shape_cast %126 : vector<1x8x32xf32> to vector<8x32xf32>
    %128 = vector.shape_cast %125 : vector<8x32xf32> to vector<1x8x32xf32>
    tpu.vector_store %arg7[%c0_24, %c0_25, %c0_26], %128 {strides = array<i32>} : memref<1x8x32xf32, #tpu.memory_space<vmem>>, vector<1x8x32xf32>,
    return
  }
  func.func @transform_0(%arg0: i32, %arg1: i32) -> (i32, i32, i32) {
    %c0_i32 = arith.constant 0 : i32
    %c0_i32_0 = arith.constant 0 : i32
    %c0_i32_1 = arith.constant 0 : i32
    return %arg0, %c0_i32, %c0_i32_0 : i32, i32, i32
  }
  func.func @transform_1(%arg0: i32, %arg1: i32) -> (i32, i32) {
    %c0_i32 = arith.constant 0 : i32
    %c0_i32_0 = arith.constant 0 : i32
    %c0_i32_1 = arith.constant 0 : i32
    return %c0_i32, %c0_i32_0 : i32, i32
  }
  func.func @transform_2(%arg0: i32, %arg1: i32) -> (i32, i32) {
    %c0_i32 = arith.constant 0 : i32
    %c0_i32_0 = arith.constant 0 : i32
    %c0_i32_1 = arith.constant 0 : i32
    return %c0_i32, %c0_i32_0 : i32, i32
  }
  func.func @transform_3(%arg0: i32, %arg1: i32) -> (i32, i32) {
    %c0_i32 = arith.constant 0 : i32
    %c0_i32_0 = arith.constant 0 : i32
    %c0_i32_1 = arith.constant 0 : i32
    return %c0_i32, %c0_i32_0 : i32, i32
  }
  func.func @transform_4(%arg0: i32, %arg1: i32) -> (i32, i32) {
    %c0_i32 = arith.constant 0 : i32
    %c0_i32_0 = arith.constant 0 : i32
    %c0_i32_1 = arith.constant 0 : i32
    return %c0_i32, %c0_i32_0 : i32, i32
  }
  func.func @transform_5(%arg0: i32, %arg1: i32) -> (i32, i32, i32) {
    %c0_i32 = arith.constant 0 : i32
    %c0_i32_0 = arith.constant 0 : i32
    return %arg0, %arg1, %c0_i32 : i32, i32, i32
  }
}

</mosaic_0001>

<bundles_post_ra>
// kernel: local_rnn_forward.1
= control target key start
LH: loop header
LB: loop body
LE: loop exit
PB: predicated region body
PF: predicated region fallthrough
CT: control target
= control target key end

     0   :  { %10 = vsyncpa [#allocation3], 0  ;;  %s1908_s0 = inlined_call_operand.hbm [shape: f32[2,16,32], index: 0, kind: input, shape index: {}]   ;;  %s1909_s1 = inlined_call_operand.hbm [shape: f32[32,96], index: 1, kind: input, shape index: {}]   ;;  %s1910_s2 = inlined_call_operand.hbm [shape: f32[32,96], index: 2, kind: input, shape index: {}]   ;;  %s1911_s3 = inlined_call_operand.hbm [shape: f32[1,96], index: 3, kind: input, shape index: {}]   ;;  %s1912_s4 = inlined_call_operand.hbm [shape: f32[1,96], index: 4, kind: input, shape index: {}]   ;;  %s1913_s5 = inlined_call_operand.hbm [shape: f32[2,8,32], index: 5, kind: output, shape index: {}]  }
   0x1   :  { %12 = vsyncpa [#allocation3 + $0x1], 0 }
   0x2   :  { %13 = vsyncpa [#allocation6], 0 }
   0x3   :  { %14 = vsyncpa [#allocation9], 0 }
   0x4   :  { %15 = vsyncpa [#allocation4], 0 }
   0x5   :  { %17 = vsyncpa [#allocation4 + $0x1], 0  ;;  %s1543_s18 = smov 0   ;;  %s1545_s19 = smov 0  }
   0x6   :  { %s1547_s20 = smov 0   ;;  %s1549_s21 = smov 0  }
   0x7   :  { %s1551_s22 = smov 0   ;;  %s1553_s23 = smov 0  }
   0x8 LB: > { %1920 = sst [smem:[#allocation16_spill]] %s1478_s18  ;;  %s986_s24 = sadd.s32 4294967295, %s1498_s23   ;;  %s1498_s23 = sphi %s1553_s23, %s23_s23   ;;  %s1494_s22 = sphi %s1551_s22, %s1943_s22   ;;  %s1490_s21 = sphi %s1549_s21, %s1942_s21   ;;  %s1486_s20 = sphi %s1547_s20, %s1941_s20   ;;  %s1482_s19 = sphi %s1545_s19, %s1940_s19   ;;  %s1478_s18 = sphi %s1543_s18, %s1939_s18  }
   0x9   : > { %s987_s25 = sadd.s32 4294967294, %s1498_s23   ;;  %p55_p0 = scmp.ne.s32.totalorder %s1482_s19, %s1478_s18 }
   0xa   : > { %p1577_p1 = scmp.eq.s32.totalorder %s986_s24, 0  ;;  %p1581_p2 = scmp.eq.s32.totalorder %s986_s24, 1 }
   0xb   : > { %p171_p3 = scmp.eq.s32.totalorder %s987_s25, 1  ;;  %p988_p5 = scmp.ge.s32.totalorder %s1498_s23, 1 }
   0xc   : > { %s1921_s26 = scalar_select %p1577_p1, 1, 0 }
   0xd   : > { %s1922_s27 = scalar_select %p1581_p2, 1, 0 }
   0xe   : > { %p1587_p4 = por %p1577_p1, %p55_p0  ;;  %p1592_p6 = por %p171_p3, %p55_p0 }
   0xf   : > { %p178_p7 = scmp.lt.s32.totalorder %s1498_s23, 3  ;;  %s1500_s6 = smov [#allocation5]  }
  0x10   : > { %s1923_s28 = scalar_select %p1587_p4, 1, 0 }
  0x11   : > { %s1924_s29 = scalar_select %p1592_p6, 1, 0 }
  0x12   : > { %p1597_p8 = pnand %p988_p5, %p178_p7  ;;  %s190_s7 = sshll.u32 %s1500_s6, 4  ;;  %s1601_s7 = int_to_ptr.vmem [resolvable:$true] %s190_s7 }
  0x13   : > { %1925 = sst [smem:[#allocation17_spill]] %s1924_s29  ;;  %s1501_s9 = smov [#allocation8]  }
  0x14   : > { %s1926_s30 = scalar_select %p1597_p8, 1, 0 }
  0x15   : > { %p1134_p9 = pneg %p1597_p8  ;;  %s217_s10 = sshll.u32 %s1501_s9, 4  ;;  %s1612_s10 = int_to_ptr.vmem [resolvable:$true] %s217_s10 }
  0x16   : > { %s1502_s11 = smov [#allocation7]   ;;  %s1266_s15 = scalar_lea.hbm %s1909_s1, 512 }
  0x17   : > { %p1608_p11 = pnand %p1134_p9, %p1577_p1  ;;  %s1614_s12 = sshll.u32 %s1502_s11, 4  ;;  %s204_s12 = int_to_ptr.vmem [resolvable:$true] %s1614_s12 }
  0x18   : > { %p1267_p12 = scmp.ne.s32.totalorder %s1909_s1, %s1266_s15  ;;  %p1273_p5 = scmp.lt.u32.totalorder %s1266_s15, %s1909_s1 }
  0x19   : > { %p1624_p13 = pneg %p1608_p11 }
  0x1b   : > { %p1269_p0 = pnand %p1624_p13, %p1267_p12 }
  0x1d   : > { %p1270_p3 = pneg %p1269_p0 }
  0x1f   : > { %p1275_p7 = pnand %p1273_p5, %p1270_p3 }
  0x21   : > { %1278 = shalt.err (!%p1275_p7)
}
  0x22   : > { %s1279_s9 = scalar_lea.vmem %s1601_s7, 512  ;;  %p1287_p1 = scmp.lt.s32.totalorder %s1601_s7, %s1601_s7 }
  0x23   : > { %p1280_p9 = scmp.ne.s32.totalorder %s1601_s7, %s1279_s9  ;;  %p1288_p4 = scmp.lt.s32.totalorder %s1279_s9, %s1279_s9 }
  0x25   : > { %p1282_p10 = pnand %p1280_p9, %p1624_p13  ;;  %p1289_p12 = por %p1288_p4, %p1287_p1 }
  0x27   : > { %p1283_p6 = pneg %p1282_p10 }
  0x29   : > { %p1290_p0 = pnand %p1289_p12, %p1283_p6 }
  0x2b   : > { %1293 = shalt.err (!%p1290_p0)
}
  0x2c   : > { %s1503_s11 = smov 128   ;;  %s1504_s13 = smov 8  }
  0x2d   : > { %1137 = dma.hbm_to_vmem [thread:$0]  (!%p1608_p11), %s1909_s1, 512, %s1601_s7, [#allocation6], %s1503_s11, %s1503_s11, %s1504_s13  }
  0x2e   : > { %s1294_s25 = scalar_lea.hbm %s1911_s3, 16 }
  0x2f   : > { %p1295_p1 = scmp.ne.s32.totalorder %s1911_s3, %s1294_s25  ;;  %p1301_p10 = scmp.lt.u32.totalorder %s1294_s25, %s1911_s3 }
  0x31   : > { %p1297_p4 = pnand %p1295_p1, %p1624_p13 }
  0x33   : > { %p1298_p6 = pneg %p1297_p4 }
  0x35   : > { %p1303_p3 = pnand %p1301_p10, %p1298_p6 }
  0x37   : > { %1306 = shalt.err (!%p1303_p3)
}
  0x38   : > { %s1307_s7 = scalar_lea.vmem %s1612_s10, 16  ;;  %s1314_s14 = scalar_lea.vmem %s1612_s10, 32 }
  0x39   : > { %p1308_p5 = scmp.ne.s32.totalorder %s1612_s10, %s1307_s7  ;;  %p1315_p12 = scmp.lt.s32.totalorder %s1612_s10, %s1612_s10 }
  0x3a   : > { %p1316_p0 = scmp.lt.s32.totalorder %s1314_s14, %s1307_s7 }
  0x3b   : > { %p1310_p7 = pnand %p1308_p5, %p1624_p13 }
  0x3c   : > { %p1317_p1 = por %p1316_p0, %p1315_p12 }
  0x3d   : > { %p1311_p9 = pneg %p1310_p7 }
  0x3f   : > { %p1318_p4 = pnand %p1317_p1, %p1311_p9 }
  0x41   : > { %1321 = shalt.err (!%p1318_p4)
}
  0x42   : > { %1143 = dma.hbm_to_vmem [thread:$0]  (!%p1608_p11), %s1911_s3, 16, %s1612_s10, [#allocation9]  }
  0x43   : > { %s1322_s17 = scalar_lea.hbm %s1910_s2, 512 }
  0x44   : > { %p1323_p6 = scmp.ne.s32.totalorder %s1910_s2, %s1322_s17  ;;  %p1329_p5 = scmp.lt.u32.totalorder %s1322_s17, %s1910_s2 }
  0x46   : > { %p1325_p10 = pnand %p1323_p6, %p1624_p13 }
  0x48   : > { %p1326_p3 = pneg %p1325_p10 }
  0x4a   : > { %p1331_p7 = pnand %p1329_p5, %p1326_p3 }
  0x4c   : > { %1334 = shalt.err (!%p1331_p7)
}
  0x4d   : > { %s1335_s14 = scalar_lea.vmem %s204_s12, 512  ;;  %p1343_p1 = scmp.lt.s32.totalorder %s204_s12, %s204_s12 }
  0x4e   : > { %p1336_p9 = scmp.ne.s32.totalorder %s204_s12, %s1335_s14  ;;  %p1344_p4 = scmp.lt.s32.totalorder %s1335_s14, %s1335_s14 }
  0x50   : > { %p1338_p12 = pnand %p1336_p9, %p1624_p13  ;;  %p1345_p8 = por %p1344_p4, %p1343_p1 }
  0x52   : > { %p1339_p0 = pneg %p1338_p12 }
  0x54   : > { %p1346_p2 = pnand %p1345_p8, %p1339_p0 }
  0x56   : > { %1349 = shalt.err (!%p1346_p2)
}
  0x57   : > { %1140 = dma.hbm_to_vmem [thread:$0]  (!%p1608_p11), %s1910_s2, 512, %s204_s12, [#allocation6], %s1503_s11, %s1503_s11, %s1504_s13  }
  0x58   : > { %s1505_s29 = smov [#allocation10]   ;;  %s1350_s25 = scalar_lea.hbm %s1912_s4, 16 }
  0x59   : > { %s228_s15 = sshll.u32 %s1505_s29, 4  ;;  %p1351_p2 = scmp.ne.s32.totalorder %s1912_s4, %s1350_s25  ;;  %s229_s15 = int_to_ptr.vmem [resolvable:$true] %s228_s15 }
  0x5a   : > { %p1357_p10 = scmp.lt.u32.totalorder %s1350_s25, %s1912_s4 }
  0x5b   : > { %p1353_p8 = pnand %p1351_p2, %p1624_p13 }
  0x5d   : > { %p1354_p6 = pneg %p1353_p8 }
  0x5f   : > { %p1359_p3 = pnand %p1357_p10, %p1354_p6 }
  0x61   : > { %1362 = shalt.err (!%p1359_p3)
}
  0x62   : > { %s1363_s12 = scalar_lea.vmem %s229_s15, 16  ;;  %s1370_s10 = scalar_lea.vmem %s229_s15, 32 }
  0x63   : > { %p1364_p5 = scmp.ne.s32.totalorder %s229_s15, %s1363_s12  ;;  %p1371_p12 = scmp.lt.s32.totalorder %s229_s15, %s229_s15 }
  0x64   : > { %p1372_p0 = scmp.lt.s32.totalorder %s1370_s10, %s1363_s12 }
  0x65   : > { %p1366_p7 = pnand %p1364_p5, %p1624_p13 }
  0x66   : > { %p1373_p1 = por %p1372_p0, %p1371_p12 }
  0x67   : > { %p1367_p9 = pneg %p1366_p7 }
  0x69   : > { %p1374_p4 = pnand %p1373_p1, %p1367_p9 }
  0x6b   : > { %1377 = shalt.err (!%p1374_p4)
}
  0x6c   : > { %1146 = dma.hbm_to_vmem [thread:$0]  (!%p1608_p11), %s1912_s4, 16, %s229_s15, [#allocation9]  }
  0x6d   : > { %s35_s24 = sadd.s32 1, %s1494_s22  ;;  %s42_s16 = sadd.s32 1, %s1486_s20 }
  0x6e   : > { %p37_p13 = scmp.ge.s32.totalorder %s35_s24, 2  ;;  %p49_p2 = scmp.ne.s32.totalorder %s1486_s20, %s1482_s19 }
  0x6f   : > { %p50_p8 = scmp.eq.s32.totalorder %s1498_s23, 0  ;;  %p1159_p6 = scmp.lt.s32.totalorder %s1498_s23, 2 }
  0x70   : > { %s1945_s24 = smov (%p37_p13, %s35_s24), 0  ;;  %p1929_p3 = scmp.ne.s32.totalorder %s1922_s27, 0 }
  0x71   : > { %p51_p10 = por %p50_p8, %p49_p2  ;;  %s39_s17 = ssub.s32 %s1494_s22, %s1945_s24 }
  0x72   : > { %p1722_p5 = por %p1929_p3, %p49_p2  ;;  %s239_s25 = sand.u32 1, %s1486_s20  }
  0x73   : > { %p40_p7 = scmp.eq.s32.totalorder %s39_s17, 0  ;;  %s994_s15 = sshll.u32 %s239_s25, 4 }
  0x74   : > { %s1022_s6 = sshll.u32 %s1494_s22, 8  ;;  %s243_s27 = scalar_lea.vmem [#allocation2], %s994_s15 }
  0x75   : > { %s1731_s9 = scalar_select %p40_p7, %s1486_s20, %s42_s16  }
  0x76   : > { %s1736_s12 = scalar_lea.hbm %s1908_s0, %s1022_s6  ;;  %s250_s10 = sshll.u32 %s243_s27, 4  ;;  %s1744_s10 = int_to_ptr.vmem [resolvable:$true] %s250_s10 }
  0x77   : > { %p1740_p11 = pnand %p1159_p6, %p51_p10  ;;  %s1746_s29 = scalar_lea.sflag [#allocation3], %s239_s25 }
  0x78   : > { %s1378_s16 = scalar_lea.hbm %s1736_s12, 256  ;;  %s1383_s6 = scalar_lea.hbm %s1908_s0, 512 }
  0x79   : > { %p1379_p9 = scmp.ne.s32.totalorder %s1736_s12, %s1378_s16  ;;  %p1380_p12 = pneg %p1740_p11 }
  0x7a   : > { %p1384_p4 = scmp.lt.u32.totalorder %s1736_s12, %s1908_s0  ;;  %p1385_p13 = scmp.lt.u32.totalorder %s1383_s6, %s1378_s16 }
  0x7b   : > { %p1381_p0 = pnand %p1380_p12, %p1379_p9  ;;  %p1387_p8 = scmp.lt.u32.totalorder %s1378_s16, %s1736_s12 }
  0x7c   : > { %p1386_p2 = por %p1385_p13, %p1384_p4 }
  0x7d   : > { %p1382_p1 = pneg %p1381_p0 }
  0x7e   : > { %p1388_p6 = por %p1387_p8, %p1386_p2 }
  0x80   : > { %p1389_p10 = pnand %p1388_p6, %p1382_p1 }
  0x82   : > { %1392 = shalt.err (!%p1389_p10)
}
  0x83   : > { %s1393_s25 = scalar_lea.vmem %s1744_s10, 256  ;;  %s1506_s27 = smov [#allocation2]  }
  0x84   : > { %p1394_p3 = scmp.ne.s32.totalorder %s1744_s10, %s1393_s25  ;;  %s1398_s17 = sshll.u32 %s1506_s27, 4  ;;  %s1399_s17 = int_to_ptr.vmem [resolvable:$false] %s1398_s17 }
  0x85   : > { %s1400_s15 = scalar_lea.vmem %s1399_s17, 512  ;;  %p1401_p0 = scmp.lt.s32.totalorder %s1744_s10, %s1399_s17 }
  0x86   : > { %p1396_p7 = pnand %p1394_p3, %p1380_p12  ;;  %p1402_p4 = scmp.lt.s32.totalorder %s1400_s15, %s1393_s25 }
  0x88   : > { %p1397_p9 = pneg %p1396_p7  ;;  %p1403_p13 = por %p1402_p4, %p1401_p0 }
  0x8a   : > { %p1404_p2 = pnand %p1403_p13, %p1397_p9 }
  0x8c   : > { %1407 = shalt.err (!%p1404_p2)
}
  0x8d   : > { %1150 = dma.hbm_to_vmem [thread:$0]  (!%p1740_p11), %s1736_s12, 256, %s1744_s10, %s1746_s29, %s1503_s11, %s1503_s11, %s1504_s13  }
  0x8e   : > { %p1932_p12 = scmp.ne.s32.totalorder %s1926_s30, 0 }
  0x8f   : > { %s1780_s16 = sand.u32 (!%p1932_p12), 1, %s1482_s19   ;;  %p1933_p1 = scmp.ne.s32.totalorder (!%p1932_p12), %s1923_s28, 0 }
  0x90   : > { %262 = sbr.rel (%p1932_p12) target bundleno = 2881 (0xb41), region = 40  ;;  %s998_s6 = sshll.u32 (!%p1932_p12), %s1780_s16, 4 }
  0x91   : > { %s265_s7 = scalar_lea.sflag (!%p1932_p12), [#allocation3], %s1780_s16  ;;  %s268_s14 = scalar_lea.vmem (!%p1932_p12), [#allocation2], %s998_s6 }
  0x97   : > { %1461 = dma.done.wait (%p1933_p1), %s265_s7, 256  }
  0x98   : > { %1463 = vsyncadd (%p1933_p1), %s265_s7, 4294967040  ;;  %p1934_p8 = scmp.ne.s32.totalorder %s1921_s26, 0 }
  0x9a   : > { %1465 = dma.done.wait (%p1934_p8), [#allocation6], 1024  }
  0x9b   : > { %1467 = vsyncadd (%p1934_p8), [#allocation6], 4294966272 }
  0x9c   : > { %1469 = dma.done.wait (%p1934_p8), [#allocation9], 32  }
  0x9d   : > { %1471 = vsyncadd (%p1934_p8), [#allocation9], 4294967264  ;;  %vm326_vm0 = vcmask 261120   ;;  %v315_v0 = vld [vmem:[#allocation5] sm:$0xff]  ;;  %v316_v1 = vld [vmem:[#allocation5 + $0x8] sm:$0xff]  ;;  %s1507_s28 = smov 64  }
  0x9e   : > { %v317_v2 = vld [vmem:[#allocation5 + $0x10] sm:$0xff]  ;;  %v1088_v3 = vpack.c.bf16 %v316_v1, %v315_v0  ;;  %v318_v4 = vld [vmem:[#allocation5 + $0x18] sm:$0xff]  ;;  %v1797_v7 = vld [vmem:[#allocation10] ss:$0 sm:$0xff]  ;;  %v1508_v26 = vmov 0.0|0.0   ;;  %vm1509_vm1 = vmmov 0  }
  0x9f   : > { %v313_v5 = vld [vmem:[%s268_s14] sm:$0xff]  ;;  %v1092_v6 = vpack.c.bf16 %v318_v4, %v317_v2  ;;  %426 = vrot.lane.b32.xlu0 %v1797_v7, %s1507_s28  ;;  %v314_v8 = vld [vmem:[%s268_s14 + $0x8] sm:$0xff]  ;;  %1096 = vmatprep.subr.bf16.mxu1 %v1508_v26  ;;  %v1510_v29 = vmov 0.0   ;;  %s1511_s26 = smov 96   ;;  %vm571_vm2 = vcmask 1046528   ;;  %vm695_vm3 = vcmask 1040384  }
  0xa0   : > { %1052 = vmatprep.mubr.msk.f32.mxu0 %vm326_vm0, %v313_v5  ;;  %1089 = vmatprep.subr.bf16.mxu0 %v1088_v3  ;;  %v1004_v9 = vld [vmem:[#allocation8] ss:$0 sm:$0xff]  ;;  %v409_v24 = vld [vmem:[#allocation7 + $0x8] sm:$0xff]  ;;  %v410_v25 = vld [vmem:[#allocation7 + $0x10] sm:$0xff]  ;;  %vm707_vm4 = vcmask 1045504   ;;  %s1003_s30 = sshll.u32 %s1780_s16, 3 }
  0xa1   : > { %1091 = vmatpush3.bf16.msra.mxu0 %v1088_v3  ;;  %v408_v23 = vld [vmem:[#allocation7] sm:$0xff]  ;;  %v411_v28 = vld [vmem:[#allocation7 + $0x18] sm:$0xff]  ;;  %1063 = vmatprep.mubr.msk.f32.mxu1 %vm1509_vm1, %v1510_v29  ;;  %s1019_s11 = sshll.u32 %s1490_s21, 7  ;;  %s310_s13 = scalar_lea.vmem [#allocation11], %s1003_s30  ;;  %vm850_vm5 = vcmask 256000   ;;  %vm848_vm6 = vcmask 261123  }
  0xa2   : > { %1093 = vmatprep.subr.bf16.mxu0 %v1092_v6  ;;  %v1097_v27 = vpack.c.bf16 %v409_v24, %v408_v23  ;;  %v1100_v30 = vpack.c.bf16 %v411_v28, %v410_v25  ;;  %s867_s12 = sshll.u32 %s310_s13, 4  ;;  %s1859_s29 = scalar_lea.hbm %s1913_s5, %s1019_s11  ;;  %s1861_s12 = int_to_ptr.vmem [resolvable:$true] %s867_s12 }
  0xa3   : > { %s853_s25 = scalar_lea.sflag [#allocation4], %s1780_s16  ;;  %s1408_s21 = scalar_lea.vmem %s1861_s12, 128 }
  0xa4   : > { %1098 = vmatpush3.bf16.msra.mxu1 %v1097_v27  ;;  %p1409_p11 = scmp.ne.s32.totalorder %s1861_s12, %s1408_s21  ;;  %s1512_s27 = smov [#allocation11]  }
  0xa5   : > { %1095 = vmatpush3.bf16.msra.mxu0 %v1092_v6  ;;  %1099 = vmatprep.subr.bf16.mxu1 %v1508_v26  ;;  %s1412_s17 = sshll.u32 %s1512_s27, 4  ;;  %s1413_s17 = int_to_ptr.vmem [resolvable:$false] %s1412_s17 }
  0xa6   : > { %1102 = vmatprep.subr.bf16.mxu0 %v1508_v26  ;;  %p1410_p6 = pnand %p1409_p11, %p1722_p5  ;;  %s1414_s15 = scalar_lea.vmem %s1413_s17, 256 }
  0xa7   : > { %p1415_p3 = scmp.lt.s32.totalorder %s1861_s12, %s1413_s17  ;;  %p1416_p7 = scmp.lt.s32.totalorder %s1414_s15, %s1408_s21 }
  0xa8   : > { %1053 = vmatmul.mubr.msk.f32.vlgmr.msra.gmra.mrb[0].mxu0 %vm326_vm0, %v314_v8  ;;  %1101 = vmatpush3.bf16.msra.mxu1 %v1100_v30  ;;  %p1411_p10 = pneg %p1410_p6 }
  0xa9   : > { %1074 = vmatprep.mubr.msk.f32.mxu0 %vm1509_vm1, %v1510_v29  ;;  %1104 = vmatpush3.bf16.msra.mxu0 %v1097_v27  ;;  %p1417_p9 = por %p1416_p7, %p1415_p3 }
  0xaa   : > { %1105 = vmatprep.subr.bf16.mxu0 %v1508_v26  ;;  %1108 = vmatprep.subr.bf16.mxu1 %v1508_v26 }
  0xab   : > { %p1418_p0 = pnand %p1417_p9, %p1411_p10 }
  0xad   : > { %1107 = vmatpush3.bf16.msra.mxu0 %v1100_v30 }
 0x111   : > { %v427_v18 = vpop.permute.xlu0 %426 }
 0x17b   : > { %v1054_v10 = vpop.f32.mrb[0].mxu0 }
 0x17c   : > { %v1802_v11 = vadd.f32 %v1054_v10, %v1004_v9  ;;  %v399_v12 = vpop.f32.mrb[1].mxu0 }
 0x17d   : > { %v1804_v13 = vadd.f32 %v1004_v9, %v399_v12 }
 0x17f   : > { %v419_v14 = vadd.f32 %v1797_v7, %v1804_v13 }
 0x181   : > { %v1008_v15 = vmul.f32 -1.442695, %v419_v14 }
 0x183   : > { %1224 = vpow2.f32 %v1008_v15 }
 0x18d   : > { %v1225_v16 = vpop.eup %1224 }
 0x18e   : > { %v423_v17 = vadd.f32 1.0, %v1225_v16 }
 0x190   : > { %1226 = vrcp.f32 %v423_v17 }
 0x19a   : > { %v1227_v19 = vpop.eup %1226 }
 0x19b   : > { %v429_v20 = vmul.f32 %v1227_v19, %v427_v18  ;;  %v436_v32 = vsub.f32 1.0, %v1227_v19 }
 0x19d   : > { %431 = vrot.lane.b32.xlu0 %v429_v20, %s1507_s28 }
 0x20f   : > { %v432_v21 = vpop.permute.xlu0 %431 }
 0x210   : > { %v434_v22 = vadd.f32 %v432_v21, %v1804_v13 }
 0x212   : > { %1228 = vtanh.f32 %v434_v22 }
 0x21c   : > { %v1229_v31 = vpop.eup %1228 }
 0x21d   : > { %438 = vrot.lane.b32.xlu1 %v1229_v31, %s1511_s26 }
 0x28f   : > { %v439_v33 = vpop.permute.xlu1 %438 }
 0x290   : > { %v441_v34 = vmul.f32 %v439_v33, %v436_v32 }
 0x292   : > { %443 = vrot.lane.b32.xlu1 %v441_v34, %s1511_s26  ;;  %v563_v59 = vrot.slane %v441_v34, 7 }
 0x304   : > { %v444_v35 = vpop.permute.xlu1 %443 }
 0x305   : > { %1064 = vmatmul.mubr.msk.f32.vlgmr.msra.gmra.mrb[0].mxu1 %vm326_vm0, %v444_v35 }
 0x306   : > { %1110 = vmatpush3.bf16.msra.mxu1 %v1097_v27  ;;  %1085 = vmatprep.mubr.msk.f32.mxu1 %vm1509_vm1, %v1510_v29 }
 0x307   : > { %1111 = vmatprep.subr.bf16.mxu1 %v1508_v26 }
 0x30a   : > { %1113 = vmatpush3.bf16.msra.mxu1 %v1100_v30 }
 0x3d8   : > { %v513_v36 = vpop.f32.mrb[0].mxu1 }
 0x3d9   : > { %v514_v37 = vadd.f32 %v1797_v7, %v513_v36  ;;  %v1065_v38 = vpop.f32.mrb[1].mxu1 }
 0x3db   : > { %v518_v39 = vrot.slane %v514_v37, 7 }
 0x3dd   : > { %534 = vrot.lane.b32.xlu0 %v518_v39, %s1507_s28  ;;  %v520_v40 = vadd.f32 %v518_v39, %v1804_v13  ;;  %v521_v41 = vadd.f32 %v518_v39, %v1802_v11 }
 0x3df   : > { %v1010_v42 = vmul.f32 -1.442695, %v520_v40  ;;  %v1011_v43 = vmul.f32 -1.442695, %v521_v41 }
 0x3e1   : > { %1230 = vpow2.f32 %v1010_v42 }
 0x3e2   : > { %1232 = vpow2.f32 %v1011_v43 }
 0x3eb   : > { %v1231_v44 = vpop.eup %1230 }
 0x3ec   : > { %v1233_v45 = vpop.eup %1232  ;;  %v528_v46 = vadd.f32 1.0, %v1231_v44 }
 0x3ed   : > { %v529_v47 = vadd.f32 1.0, %v1233_v45 }
 0x3ee   : > { %1234 = vrcp.f32 %v528_v46 }
 0x3ef   : > { %1236 = vrcp.f32 %v529_v47 }
 0x3f8   : > { %v1235_v48 = vpop.eup %1234 }
 0x3f9   : > { %v1237_v49 = vpop.eup %1236  ;;  %v551_v62 = vsub.f32 1.0, %v1235_v48  ;;  %v565_v3 = vmul.f32 %v1235_v48, %v563_v59 }
 0x3fa   : > { %v552_v60 = vsub.f32 1.0, %v1237_v49  ;;  %v566_v0 = vmul.f32 %v1237_v49, %v563_v59 }
 0x44f   : > { %v535_v50 = vpop.permute.xlu0 %534 }
 0x450   : > { %v537_v51 = vmul.f32 %v1235_v48, %v535_v50  ;;  %v538_v52 = vmul.f32 %v1237_v49, %v535_v50 }
 0x452   : > { %543 = vrot.lane.b32.xlu0 %v538_v52, %s1507_s28  ;;  %541 = vrot.lane.b32.xlu1 %v537_v51, %s1507_s28 }
 0x4c4   : > { %v544_v53 = vpop.permute.xlu0 %543  ;;  %v542_v54 = vpop.permute.xlu1 %541 }
 0x4c5   : > { %v548_v55 = vadd.f32 %v544_v53, %v1802_v11  ;;  %v547_v56 = vadd.f32 %v542_v54, %v1804_v13 }
 0x4c7   : > { %1238 = vtanh.f32 %v548_v55 }
 0x4c8   : > { %1240 = vtanh.f32 %v547_v56 }
 0x4d1   : > { %v1239_v57 = vpop.eup %1238 }
 0x4d2   : > { %v1241_v58 = vpop.eup %1240  ;;  %557 = vrot.lane.b32.xlu0 %v1239_v57, %s1511_s26 }
 0x4d3   : > { %555 = vrot.lane.b32.xlu1 %v1241_v58, %s1511_s26 }
 0x544   : > { %v558_v61 = vpop.permute.xlu0 %557 }
 0x545   : > { %v562_v63 = vmul.f32 %v558_v61, %v552_v60  ;;  %v556_v1 = vpop.permute.xlu1 %555 }
 0x546   : > { %v561_v2 = vmul.f32 %v556_v1, %v551_v62 }
 0x547   : > { %v568_v4 = vadd.f32 %v566_v0, %v562_v63 }
 0x548   : > { %v567_v5 = vadd.f32 %v565_v3, %v561_v2 }
 0x549   : > { %v573_v6 = vrot.slane %v568_v4, 1  ;;  %v697_v8 = vrot.slane %v568_v4, 7 }
 0x54a   : > { %v572_v9 = vrot.slane %v567_v5, 1  ;;  %v696_v10 = vrot.slane %v567_v5, 7 }
 0x54c   : > { %v574_v12 = vsel %vm571_vm2, %v572_v9, %v573_v6  ;;  %v698_v14 = vsel %vm695_vm3, %v696_v10, %v697_v8 }
 0x54d   : > { %575 = vrot.lane.b32.xlu1 %v574_v12, %s1511_s26 }
 0x5bf   : > { %v576_v15 = vpop.permute.xlu1 %575 }
 0x5c0   : > { %1075 = vmatmul.mubr.msk.f32.vlgmr.msra.gmra.mrb[2].mxu0 %vm326_vm0, %v576_v15 }
 0x693   : > { %v645_v16 = vpop.f32.mrb[2].mxu0 }
 0x694   : > { %v646_v17 = vadd.f32 %v1797_v7, %v645_v16  ;;  %v1076_v18 = vpop.f32.mrb[3].mxu0 }
 0x696   : > { %v650_v19 = vrot.slane %v646_v17, 6 }
 0x698   : > { %666 = vrot.lane.b32.xlu0 %v650_v19, %s1507_s28  ;;  %v652_v20 = vadd.f32 %v650_v19, %v1804_v13  ;;  %v653_v21 = vadd.f32 %v650_v19, %v1802_v11 }
 0x69a   : > { %v1013_v22 = vmul.f32 -1.442695, %v652_v20  ;;  %v1014_v23 = vmul.f32 -1.442695, %v653_v21 }
 0x69c   : > { %1242 = vpow2.f32 %v1013_v22 }
 0x69d   : > { %1244 = vpow2.f32 %v1014_v23 }
 0x6a6   : > { %v1243_v24 = vpop.eup %1242 }
 0x6a7   : > { %v1245_v25 = vpop.eup %1244  ;;  %v660_v26 = vadd.f32 1.0, %v1243_v24 }
 0x6a8   : > { %v661_v27 = vadd.f32 1.0, %v1245_v25 }
 0x6a9   : > { %1246 = vrcp.f32 %v660_v26 }
 0x6aa   : > { %1248 = vrcp.f32 %v661_v27 }
 0x6b3   : > { %v1247_v28 = vpop.eup %1246 }
 0x6b4   : > { %v1249_v29 = vpop.eup %1248  ;;  %v683_v41 = vsub.f32 1.0, %v1247_v28  ;;  %v701_v45 = vmul.f32 %v1247_v28, %v696_v10 }
 0x6b5   : > { %v684_v39 = vsub.f32 1.0, %v1249_v29  ;;  %v702_v42 = vmul.f32 %v1249_v29, %v698_v14 }
 0x70a   : > { %v667_v30 = vpop.permute.xlu0 %666 }
 0x70b   : > { %v669_v31 = vmul.f32 %v1247_v28, %v667_v30  ;;  %v670_v32 = vmul.f32 %v1249_v29, %v667_v30 }
 0x70d   : > { %675 = vrot.lane.b32.xlu0 %v670_v32, %s1507_s28  ;;  %673 = vrot.lane.b32.xlu1 %v669_v31, %s1507_s28 }
 0x77f   : > { %v676_v33 = vpop.permute.xlu0 %675  ;;  %v674_v34 = vpop.permute.xlu1 %673 }
 0x780   : > { %v680_v35 = vadd.f32 %v676_v33, %v1802_v11  ;;  %v679_v36 = vadd.f32 %v674_v34, %v1804_v13 }
 0x782   : > { %1250 = vtanh.f32 %v680_v35 }
 0x783   : > { %1252 = vtanh.f32 %v679_v36 }
 0x78c   : > { %v1251_v37 = vpop.eup %1250 }
 0x78d   : > { %v1253_v38 = vpop.eup %1252  ;;  %689 = vrot.lane.b32.xlu0 %v1251_v37, %s1511_s26 }
 0x78e   : > { %687 = vrot.lane.b32.xlu1 %v1253_v38, %s1511_s26 }
 0x7ff   : > { %v690_v40 = vpop.permute.xlu0 %689 }
 0x800   : > { %v694_v43 = vmul.f32 %v690_v40, %v684_v39  ;;  %v688_v44 = vpop.permute.xlu1 %687 }
 0x801   : > { %v693_v46 = vmul.f32 %v688_v44, %v683_v41 }
 0x802   : > { %v704_v47 = vadd.f32 %v702_v42, %v694_v43 }
 0x803   : > { %v703_v48 = vadd.f32 %v701_v45, %v693_v46 }
 0x804   : > { %v709_v49 = vrot.slane %v704_v47, 2  ;;  %v832_v50 = vrot.slane %v704_v47, 7 }
 0x805   : > { %v708_v51 = vrot.slane %v703_v48, 2  ;;  %v831_v52 = vrot.slane %v703_v48, 7 }
 0x807   : > { %v710_v53 = vsel %vm707_vm4, %v708_v51, %v709_v49  ;;  %v833_v54 = vsel %vm695_vm3, %v831_v52, %v832_v50 }
 0x808   : > { %711 = vrot.lane.b32.xlu1 %v710_v53, %s1511_s26 }
 0x87a   : > { %v712_v55 = vpop.permute.xlu1 %711 }
 0x87b   : > { %1086 = vmatmul.mubr.msk.f32.vlgmr.msra.gmra.mrb[2].mxu1 %vm326_vm0, %v712_v55 }
 0x94e   : > { %v781_v56 = vpop.f32.mrb[2].mxu1 }
 0x94f   : > { %v782_v57 = vadd.f32 %v1797_v7, %v781_v56  ;;  %v1087_v58 = vpop.f32.mrb[3].mxu1 }
 0x951   : > { %v786_v59 = vrot.slane %v782_v57, 5 }
 0x953   : > { %802 = vrot.lane.b32.xlu0 %v786_v59, %s1507_s28  ;;  %v788_v60 = vadd.f32 %v786_v59, %v1804_v13  ;;  %v789_v61 = vadd.f32 %v786_v59, %v1802_v11 }
 0x955   : > { %v1016_v62 = vmul.f32 -1.442695, %v788_v60  ;;  %v1017_v63 = vmul.f32 -1.442695, %v789_v61 }
 0x957   : > { %1254 = vpow2.f32 %v1016_v62 }
 0x958   : > { %1256 = vpow2.f32 %v1017_v63 }
 0x961   : > { %v1255_v0 = vpop.eup %1254 }
 0x962   : > { %v1257_v1 = vpop.eup %1256  ;;  %v796_v2 = vadd.f32 1.0, %v1255_v0 }
 0x963   : > { %v797_v3 = vadd.f32 1.0, %v1257_v1 }
 0x964   : > { %1258 = vrcp.f32 %v796_v2 }
 0x965   : > { %1260 = vrcp.f32 %v797_v3 }
 0x96e   : > { %v1259_v4 = vpop.eup %1258 }
 0x96f   : > { %v1261_v7 = vpop.eup %1260  ;;  %v819_v19 = vsub.f32 1.0, %v1259_v4  ;;  %v836_v23 = vmul.f32 %v1259_v4, %v831_v52 }
 0x970   : > { %v820_v17 = vsub.f32 1.0, %v1261_v7  ;;  %v837_v20 = vmul.f32 %v1261_v7, %v833_v54 }
 0x9c5   : > { %v803_v5 = vpop.permute.xlu0 %802 }
 0x9c6   : > { %v805_v6 = vmul.f32 %v1259_v4, %v803_v5  ;;  %v806_v8 = vmul.f32 %v1261_v7, %v803_v5 }
 0x9c8   : > { %811 = vrot.lane.b32.xlu0 %v806_v8, %s1507_s28  ;;  %809 = vrot.lane.b32.xlu1 %v805_v6, %s1507_s28 }
 0xa3a   : > { %v812_v9 = vpop.permute.xlu0 %811  ;;  %v810_v10 = vpop.permute.xlu1 %809 }
 0xa3b   : > { %v816_v12 = vadd.f32 %v812_v9, %v1802_v11  ;;  %v815_v14 = vadd.f32 %v810_v10, %v1804_v13 }
 0xa3d   : > { %1262 = vtanh.f32 %v816_v12 }
 0xa3e   : > { %1264 = vtanh.f32 %v815_v14 }
 0xa47   : > { %v1263_v15 = vpop.eup %1262 }
 0xa48   : > { %v1265_v16 = vpop.eup %1264  ;;  %825 = vrot.lane.b32.xlu0 %v1263_v15, %s1511_s26 }
 0xa49   : > { %823 = vrot.lane.b32.xlu1 %v1265_v16, %s1511_s26 }
 0xaba   : > { %v826_v18 = vpop.permute.xlu0 %825 }
 0xabb   : > { %v830_v21 = vmul.f32 %v826_v18, %v820_v17  ;;  %v824_v22 = vpop.permute.xlu1 %823 }
 0xabc   : > { %v829_v11 = vmul.f32 %v824_v22, %v819_v19 }
 0xabd   : > { %v839_v24 = vadd.f32 %v837_v20, %v830_v21 }
 0xabe   : > { %v838_v13 = vadd.f32 %v836_v23, %v829_v11 }
 0xabf   : > { %844 = vrot.lane.b32.xlu0 %v839_v24, %s1511_s26 }
 0xac0   : > { %842 = vrot.lane.b32.xlu1 %v838_v13, %s1511_s26 }
 0xb31   : > { %v845_v25 = vpop.permute.xlu0 %844 }
 0xb32   : > { %851 = vst.msk [vmem:[%s310_s13 + $0x5] sm:$0x7] %vm850_vm5, %v845_v25  ;;  %v843_v26 = vpop.permute.xlu1 %842 }
 0xb33   : > { %849 = vst.msk [vmem:[%s310_s13 - $0x3] sm:$0xf8] %vm848_vm6, %v843_v26 }
 0xb34   : > { %1421 = shalt.err (!%p1418_p0)
}
 0xb35   : > { %s1422_s16 = scalar_lea.hbm %s1859_s29, 128  ;;  %s1426_s14 = scalar_lea.hbm %s1913_s5, 256 }
 0xb36   : > { %p1423_p4 = scmp.ne.s32.totalorder %s1859_s29, %s1422_s16  ;;  %p1427_p12 = scmp.lt.u32.totalorder %s1859_s29, %s1913_s5 }
 0xb37   : > { %p1428_p1 = scmp.lt.u32.totalorder %s1426_s14, %s1422_s16  ;;  %p1430_p11 = scmp.lt.u32.totalorder %s1422_s16, %s1859_s29 }
 0xb38   : > { %p1424_p13 = pnand %p1423_p4, %p1722_p5 }
 0xb39   : > { %p1429_p8 = por %p1428_p1, %p1427_p12 }
 0xb3a   : > { %p1425_p2 = pneg %p1424_p13 }
 0xb3b   : > { %p1431_p6 = por %p1430_p11, %p1429_p8 }
 0xb3d   : > { %p1432_p10 = pnand %p1431_p6, %p1425_p2 }
 0xb3f   : > { %1435 = shalt.err (!%p1432_p10)
}
 0xb40   : > { %1132 = dma.vmem_to_hbm [thread:$0]  (%p1722_p5), %s1861_s12, 128, %s1859_s29, %s853_s25  }
 0xb41 PF: > { %s1935_s30 = sld [smem:[#allocation16_spill]]  ;;  %s1936_s11 = sld [smem:[#allocation17_spill]] }
 0xb42   : > { %p1938_p7 = scmp.ge.s32.totalorder %s1498_s23, 2 }
 0xb47   : > { %s879_s13 = sand.u32 1, %s1935_s30   ;;  %p1937_p3 = scmp.ne.s32.totalorder %s1936_s11, 0 }
 0xb48   : > { %s880_s10 = scalar_lea.sflag [#allocation4], %s879_s13 }
 0xb49   : > { %p1152_p9 = pnand %p1938_p7, %p1937_p3 }
 0xb4b   : > { %1473 = dma.done.wait (!%p1152_p9), %s880_s10, 128  }
 0xb4c   : > { %1475 = vsyncadd (!%p1152_p9), %s880_s10, 4294967168  ;;  %s23_s23 = sadd.s32 1, %s1498_s23   ;;  %s1939_s18 = smov %s1482_s19 }
 0xb4d   : > { %p20_p0 = scmp.ge.s32.totalorder %s23_s23, 4   ;;  %s1940_s19 = smov %s1486_s20 }
 0xb4e   : > { %s1941_s20 = smov %s1731_s9  ;;  %s1942_s21 = smov %s1494_s22 }
 0xb4f   : > { %s1943_s22 = smov %s1945_s24  ;;  %22 = sbr.rel (!%p20_p0) target bundleno = 8 (0x8), region = 102 }
 0xb56   :  { %885 = vsyncpa [#allocation3], 1 }
 0xb57   :  { %887 = vsyncpa [#allocation3 + $0x1], 1 }
 0xb58   :  { %888 = vsyncpa [#allocation6], 1 }
 0xb59   :  { %889 = vsyncpa [#allocation9], 1 }
 0xb5a   :  { %890 = vsyncpa [#allocation4], 1 }
 0xb5b   :  { %892 = vsyncpa [#allocation4 + $0x1], 1 }

</bundles_post_ra>
